<compile_context>
chip_gen: v5e
topology: v5e:2x2
jax: 0.10.0
libtpu: 0.0.40
codegen_flags: <defaults>
</compile_context>

<pallas_src>
import functools

import jax
import jax.numpy as jnp
from jax.experimental import pallas as pl
from jax.experimental.pallas import tpu as pltpu

_LANES = 128


def _tile_partial_sums(pred_ref, tgt_ref, mask, *, num_classes, gamma):
    """Per-pixel CE / focal statistics for one dense (TH, 128) pixel tile.

    Returns (nll, beta, beta*nll), each (TH, 128) float32.
    """
    tgt = tgt_ref[0, 0].astype(jnp.int32)                       # (TH, 128)

    # Unrolled class loop (C is small, e.g. 3 for trimaps); running max keeps
    # everything as dense (TH, 128) VPU work -- no sublane (XLU) reductions.
    logits = []
    m = None
    for c in range(num_classes):
        lc = pred_ref[0, c].astype(jnp.float32)                 # (TH, 128)
        if mask is not None:
            lc = jnp.where(mask, lc, 0.0)    # sanitize garbage before exp/log
        logits.append(lc)
        m = lc if m is None else jnp.maximum(m, lc)

    sum_ez = None
    z_t = None
    for c in range(num_classes):
        zc = logits[c] - m
        ez = jnp.exp(zc)
        sum_ez = ez if sum_ez is None else sum_ez + ez
        # TODO(synk): no ignore_index handling (PyTorch CE default -100); targets
        # outside [0, C) silently yield pt = 0 here instead of being excluded.
        sel = jnp.where(tgt == c, zc, 0.0)
        z_t = sel if z_t is None else z_t + sel

    log_pt = z_t - jnp.log(sum_ez)                              # (TH, 128)
    pt = jnp.exp(log_pt)               # EUP; replaces onehot*ez reduce + divide
    nll = -log_pt
    om = jnp.maximum(1.0 - pt, 0.0)
    beta = om * om if gamma == 2.0 else om ** gamma

    if mask is not None:
        validf = mask.astype(jnp.float32)
        nll = nll * validf
        beta = beta * validf
    return nll, beta, beta * nll


def _ce_focal_kernel(pred_ref, tgt_ref, nll_out, beta_out, fnum_out,
                     acc_nll, acc_beta, acc_fnum, *,
                     num_classes, gamma, th, t_seg, p_total, needs_mask,
                     acc_rows):
    """Grid (N, S, T): per-sample (optionally split) partial loss sums.

    pred_ref : (1, C, TH, 128) logits block (caller dtype, cast in-kernel)
    tgt_ref  : (1, 1, TH, 128) integer targets block
    *_out    : (1, 1, 1, 1) f32 per-(sample, split) sums
    acc_*    : (ACC_ROWS, 128) f32 dense VMEM accumulators
    """
    s = pl.program_id(1)     # per-sample spatial split (keeps v7x dual-TC busy)
    t = pl.program_id(2)     # row-tile index within the split (reduction axis)

    @pl.when(t == 0)
    def _():
        acc_nll[...] = jnp.zeros_like(acc_nll)
        acc_beta[...] = jnp.zeros_like(acc_beta)
        acc_fnum[...] = jnp.zeros_like(acc_fnum)

    def fold(x):             # (TH, 128) -> (ACC_ROWS, 128), pure VPU adds
        if th == acc_rows:
            return x
        return jnp.sum(x.reshape(th // acc_rows, acc_rows, _LANES), axis=0)

    def accumulate(mask):
        nll, beta, fnum = _tile_partial_sums(
            pred_ref, tgt_ref, mask, num_classes=num_classes, gamma=gamma)
        acc_nll[...] += fold(nll)
        acc_beta[...] += fold(beta)
        acc_fnum[...] += fold(fnum)

    if not needs_mask:
        accumulate(None)     # hot path: no iota / compares / mask multiplies
    else:
        # Invalid pixels (lane padding and/or ragged row tile) only exist in the
        # globally-last tile; keep the masked epilogue off the hot steps.
        is_last = jnp.logical_and(s == pl.num_programs(1) - 1,
                                  t == pl.num_programs(2) - 1)

        @pl.when(jnp.logical_not(is_last))
        def _():
            accumulate(None)

        @pl.when(is_last)
        def _():
            row = jax.lax.broadcasted_iota(jnp.int32, (th, _LANES), 0)
            lane = jax.lax.broadcasted_iota(jnp.int32, (th, _LANES), 1)
            base_row = (s * t_seg + t) * th
            flat = (base_row + row) * _LANES + lane
            accumulate(flat < p_total)

    # Final cross-lane reductions + tiny stores happen once per (sample, split).
    @pl.when(t == pl.num_programs(2) - 1)
    def _():
        nll_out[0, 0] = jnp.sum(acc_nll[...], keepdims=True)
        beta_out[0, 0] = jnp.sum(acc_beta[...], keepdims=True)
        fnum_out[0, 0] = jnp.sum(acc_fnum[...], keepdims=True)


def ce_combined_loss(pred, target, *, ce_weight=1.0, focal_weight=0.1,
                     gamma=2.0, eps=1e-12, max_rows_per_tile=4096,
                     vmem_budget_bytes=20 * 1024 * 1024):
    """JAX/Pallas equivalent of CECombinedLoss.forward(pred, target).

    pred:   (N, C, H, W) logits (any float dtype; cast to f32 in-kernel)
    target: (N, H, W) integer class indices
    Returns (loss, {'ce_loss', 'focal_loss'}).
    """
    # TODO(synk): forward only -- pallas_call is not auto-differentiable; a
    # custom_vjp / backward kernel is required before using this under jax.grad.
    N, C, H, W = pred.shape
    P = H * W
    R = -(-P // _LANES)                    # pixel rows after (rows, 128) layout
    R128 = R * _LANES

    # Re-lay-out the pixel axis onto (sublane=row, lane=128).  Reshapes are
    # free; padding (one extra HBM pass) only happens when H*W % 128 != 0.
    pred_r = pred.reshape(N, C, P)
    tgt_r = target.reshape(N, 1, P)
    if R128 != P:
        pad = R128 - P
        pred_r = jnp.pad(pred_r, ((0, 0), (0, 0), (0, pad)))
        tgt_r = jnp.pad(tgt_r, ((0, 0), (0, 0), (0, pad)))
    pred_r = pred_r.reshape(N, C, R, _LANES)
    tgt_r = tgt_r.reshape(N, 1, R, _LANES)

    # Row-tile size: biggest multiple of 8 whose double-buffered input blocks
    # stay inside the (v7x-safe) VMEM budget.  Dense layout => no sublane
    # padding, so the byte estimate is exact.
    pred_bytes = jnp.dtype(pred.dtype).itemsize
    tgt_bytes = jnp.dtype(target.dtype).itemsize
    bytes_per_row = _LANES * (C * pred_bytes + tgt_bytes)
    rows_cap = max(8, (vmem_budget_bytes // (2 * bytes_per_row)) // 8 * 8)
    th = int(min(max_rows_per_tile, rows_cap))
    if R <= th:
        th = R                             # full-dim block ((8,128) rule waived)
    else:
        th = max(8, (th // 8) * 8)
    t_total = -(-R // th)

    # Keep both v7x TensorCores busy when batch == 1 by splitting each sample's
    # rows into two parallel segments (only when the tiles divide evenly).
    num_splits = 2 if (N == 1 and t_total >= 2 and t_total % 2 == 0) else 1
    t_seg = t_total // num_splits

    needs_mask = (R128 != P) or (t_total * th != R)
    acc_rows = 8 if (th >= 8 and th % 8 == 0) else th

    kernel = functools.partial(
        _ce_focal_kernel, num_classes=C, gamma=gamma, th=th, t_seg=t_seg,
        p_total=P, needs_mask=needs_mask, acc_rows=acc_rows)

    out_shapes = tuple(jax.ShapeDtypeStruct((N, num_splits, 1, 1), jnp.float32)
                       for _ in range(3))
    out_spec = pl.BlockSpec((1, 1, 1, 1), lambda n, s, t: (n, s, 0, 0))

    nll_o, beta_o, fnum_o = pl.pallas_call(
        kernel,
        out_shape=out_shapes,
        grid=(N, num_splits, t_seg),
        in_specs=[
            pl.BlockSpec((1, C, th, _LANES),
                         lambda n, s, t: (n, 0, s * t_seg + t, 0)),
            pl.BlockSpec((1, 1, th, _LANES),
                         lambda n, s, t: (n, 0, s * t_seg + t, 0)),
        ],
        out_specs=[out_spec, out_spec, out_spec],
        scratch_shapes=[
            pltpu.VMEM((acc_rows, _LANES), jnp.float32),
            pltpu.VMEM((acc_rows, _LANES), jnp.float32),
            pltpu.VMEM((acc_rows, _LANES), jnp.float32),
        ],
        compiler_params=pltpu.CompilerParams(
            dimension_semantics=("parallel", "parallel", "arbitrary"),
            vmem_limit_bytes=32 * 1024 * 1024),
    )(pred_r, tgt_r)

    ce_sum = jnp.sum(nll_o.reshape(N, -1), axis=1)      # per-sample sums
    beta_sum = jnp.sum(beta_o.reshape(N, -1), axis=1)
    fnum_sum = jnp.sum(fnum_o.reshape(N, -1), axis=1)

    total = N * P
    ce_loss = jnp.sum(ce_sum) / total
    # TODO(synk): NormalizedFocalLossSoftmax is not in the provided snippet; the
    # standard isegm formula (mult = HW / (sum beta + eps), mean over pixels) is
    # assumed -- verify the denominator / detach of mult against the real module.
    mult = P / (beta_sum + eps)
    focal_loss = jnp.sum(mult * fnum_sum) / total

    loss = ce_weight * ce_loss + focal_weight * focal_loss
    aux = {'ce_loss': jax.lax.stop_gradient(ce_loss),       # mirrors .detach()
           'focal_loss': jax.lax.stop_gradient(focal_loss)}
    return loss, aux


def _reference(pred, target, *, ce_weight=1.0, focal_weight=0.1,
               gamma=2.0, eps=1e-12):
    """Pure-JAX reference for correctness checking."""
    N, C, H, W = pred.shape
    logp = jax.nn.log_softmax(pred.astype(jnp.float32), axis=1)   # (N,C,H,W)
    oh = jax.nn.one_hot(target, C, axis=1, dtype=jnp.float32)
    log_pt = jnp.sum(logp * oh, axis=1)                           # (N,H,W)
    nll = -log_pt
    ce = jnp.mean(nll)
    pt = jnp.exp(log_pt)
    beta = (1.0 - pt) ** gamma
    beta_sum = jnp.sum(beta, axis=(1, 2), keepdims=True)
    mult = (H * W) / (beta_sum + eps)
    focal = jnp.mean(mult * beta * nll)
    return ce_weight * ce + focal_weight * focal, ce, focal


def _check(pred, target, **kw):
    loss, aux = ce_combined_loss(pred, target, **kw)
    loss = jax.block_until_ready(loss)
    ref_loss, ref_ce, ref_focal = _reference(pred, target)
    assert jnp.allclose(loss, ref_loss, atol=1e-5, rtol=1e-5), (loss, ref_loss)
    assert jnp.allclose(aux['ce_loss'], ref_ce, atol=1e-5, rtol=1e-5)
    assert jnp.allclose(aux['focal_loss'], ref_focal, atol=1e-5, rtol=1e-5)


if __name__ == "__main__":
    key = jax.random.PRNGKey(0)
    k1, k2, k3, k4, k5, k6, k7, k8 = jax.random.split(key, 8)

    # Case 1: trimap-style shapes, P % 128 == 0, single tile, no masking path.
    pred1 = jax.random.normal(k1, (2, 3, 16, 16), dtype=jnp.float32)
    tgt1 = jax.random.randint(k2, (2, 16, 16), 0, 3, dtype=jnp.int32)
    _check(pred1, tgt1)

    # Case 2: P % 128 != 0 -> wrapper pad + masked (last-tile) epilogue.
    pred2 = jax.random.normal(k3, (2, 3, 24, 24), dtype=jnp.float32)
    tgt2 = jax.random.randint(k4, (2, 24, 24), 0, 3, dtype=jnp.int32)
    _check(pred2, tgt2)

    # Case 3: multi-row-tile grid with a ragged last row tile (R=20, TH=8).
    pred3 = jax.random.normal(k5, (2, 3, 40, 64), dtype=jnp.float32)
    tgt3 = jax.random.randint(k6, (2, 40, 64), 0, 3, dtype=jnp.int32)
    _check(pred3, tgt3, max_rows_per_tile=8)

    # Case 4: batch of 1 -> per-sample spatial split (S axis) + bf16 logits
    # exercising the in-kernel cast path (no wrapper upcast of the HBM stream).
    pred4 = jax.random.normal(k7, (1, 3, 64, 64), dtype=jnp.bfloat16)
    tgt4 = jax.random.randint(k8, (1, 64, 64), 0, 3, dtype=jnp.int32)
    _check(pred4, tgt4, max_rows_per_tile=8)

    print("KERNEL_OK")
</pallas_src>

<mosaic_0001>
module attributes {stable_mosaic.version = 11 : i64} {
  func.func @_ce_focal_kernel(%arg0: i32, %arg1: i32, %arg2: i32, %arg3: memref<1x3x2x128xf32, #tpu.memory_space<vmem>>, %arg4: memref<1x1x2x128xi32, #tpu.memory_space<vmem>>, %arg5: memref<1x1x1x1xf32, #tpu.memory_space<vmem>>, %arg6: memref<1x1x1x1xf32, #tpu.memory_space<vmem>>, %arg7: memref<1x1x1x1xf32, #tpu.memory_space<vmem>>, %arg8: memref<2x128xf32, #tpu.memory_space<vmem>>, %arg9: memref<2x128xf32, #tpu.memory_space<vmem>>, %arg10: memref<2x128xf32, #tpu.memory_space<vmem>>) attributes {dimension_semantics = [#tpu.dimension_semantics<parallel>, #tpu.dimension_semantics<parallel>, #tpu.dimension_semantics<arbitrary>], iteration_bounds = array<i64: 2, 1, 1>, scalar_prefetch = 0 : i64, scratch_operands = 3 : i64, tpu.core_type = #tpu.core_type<tc>, window_params = [{transform_indices = @transform_0, window_bounds = array<i64: 1, 3, 2, 128>}, {transform_indices = @transform_1, window_bounds = array<i64: 1, 1, 2, 128>}, {transform_indices = @transform_2, window_bounds = array<i64: 1, 1, 1, 1>}, {transform_indices = @transform_3, window_bounds = array<i64: 1, 1, 1, 1>}, {transform_indices = @transform_4, window_bounds = array<i64: 1, 1, 1, 1>}]} {
    %c0_i32 = arith.constant 0 : i32
    %0 = arith.cmpi eq, %arg2, %c0_i32 : i32
    %1 = arith.extui %0 : i1 to i32
    %c0_i32_0 = arith.constant 0 : i32
    %2 = arith.cmpi ne, %1, %c0_i32_0 : i32
    scf.if %2 {
      %cst_34 = arith.constant 0.000000e+00 : f32
      %58 = vector.broadcast %cst_34 : f32 to vector<2x128xf32>
      %c0_35 = arith.constant 0 : index
      %c0_36 = arith.constant 0 : index
      %59 = vector.load %arg8[%c0_35, %c0_36] : memref<2x128xf32, #tpu.memory_space<vmem>>, vector<2x128xf32>
      tpu.vector_store %arg8[%c0_35, %c0_36], %58 {strides = array<i32>} : memref<2x128xf32, #tpu.memory_space<vmem>>, vector<2x128xf32>,
      %cst_37 = arith.constant 0.000000e+00 : f32
      %60 = vector.broadcast %cst_37 : f32 to vector<2x128xf32>
      %c0_38 = arith.constant 0 : index
      %c0_39 = arith.constant 0 : index
      %61 = vector.load %arg9[%c0_38, %c0_39] : memref<2x128xf32, #tpu.memory_space<vmem>>, vector<2x128xf32>
      tpu.vector_store %arg9[%c0_38, %c0_39], %60 {strides = array<i32>} : memref<2x128xf32, #tpu.memory_space<vmem>>, vector<2x128xf32>,
      %cst_40 = arith.constant 0.000000e+00 : f32
      %62 = vector.broadcast %cst_40 : f32 to vector<2x128xf32>
      %c0_41 = arith.constant 0 : index
      %c0_42 = arith.constant 0 : index
      %63 = vector.load %arg10[%c0_41, %c0_42] : memref<2x128xf32, #tpu.memory_space<vmem>>, vector<2x128xf32>
      tpu.vector_store %arg10[%c0_41, %c0_42], %62 {strides = array<i32>} : memref<2x128xf32, #tpu.memory_space<vmem>>, vector<2x128xf32>,
    } else {
    }
    %c0 = arith.constant 0 : index
    %c0_1 = arith.constant 0 : index
    %c0_2 = arith.constant 0 : index
    %c0_3 = arith.constant 0 : index
    %3 = vector.load %arg4[%c0, %c0_1, %c0_2, %c0_3] : memref<1x1x2x128xi32, #tpu.memory_space<vmem>>, vector<1x1x2x128xi32>
    %4 = vector.shape_cast %3 : vector<1x1x2x128xi32> to vector<2x128xi32>
    %c0_4 = arith.constant 0 : index
    %c0_5 = arith.constant 0 : index
    %c0_6 = arith.constant 0 : index
    %c0_7 = arith.constant 0 : index
    %5 = vector.load %arg3[%c0_4, %c0_5, %c0_6, %c0_7] : memref<1x3x2x128xf32, #tpu.memory_space<vmem>>, vector<1x1x2x128xf32>
    %6 = vector.shape_cast %5 : vector<1x1x2x128xf32> to vector<2x128xf32>
    %c0_8 = arith.constant 0 : index
    %c1 = arith.constant 1 : index
    %c0_9 = arith.constant 0 : index
    %c0_10 = arith.constant 0 : index
    %7 = vector.load %arg3[%c0_8, %c1, %c0_9, %c0_10] : memref<1x3x2x128xf32, #tpu.memory_space<vmem>>, vector<1x1x2x128xf32>
    %8 = vector.shape_cast %7 : vector<1x1x2x128xf32> to vector<2x128xf32>
    %9 = arith.maximumf %6, %8 : vector<2x128xf32>
    %c0_11 = arith.constant 0 : index
    %c2 = arith.constant 2 : index
    %c0_12 = arith.constant 0 : index
    %c0_13 = arith.constant 0 : index
    %10 = vector.load %arg3[%c0_11, %c2, %c0_12, %c0_13] : memref<1x3x2x128xf32, #tpu.memory_space<vmem>>, vector<1x1x2x128xf32>
    %11 = vector.shape_cast %10 : vector<1x1x2x128xf32> to vector<2x128xf32>
    %12 = arith.maximumf %9, %11 : vector<2x128xf32>
    %13 = arith.subf %6, %12 : vector<2x128xf32>
    %14 = math.exp %13 : vector<2x128xf32>
    %c0_i32_14 = arith.constant 0 : i32
    %15 = vector.broadcast %c0_i32_14 : i32 to vector<2x128xi32>
    %16 = arith.cmpi eq, %4, %15 : vector<2x128xi32>
    %cst = arith.constant 0.000000e+00 : f32
    %17 = vector.broadcast %cst : f32 to vector<2x128xf32>
    %18 = arith.select %16, %13, %17 : vector<2x128xi1>, vector<2x128xf32>
    %19 = arith.subf %8, %12 : vector<2x128xf32>
    %20 = math.exp %19 : vector<2x128xf32>
    %21 = arith.addf %14, %20 : vector<2x128xf32>
    %c1_i32 = arith.constant 1 : i32
    %22 = vector.broadcast %c1_i32 : i32 to vector<2x128xi32>
    %23 = arith.cmpi eq, %4, %22 : vector<2x128xi32>
    %cst_15 = arith.constant 0.000000e+00 : f32
    %24 = vector.broadcast %cst_15 : f32 to vector<2x128xf32>
    %25 = arith.select %23, %19, %24 : vector<2x128xi1>, vector<2x128xf32>
    %26 = arith.addf %18, %25 : vector<2x128xf32>
    %27 = arith.subf %11, %12 : vector<2x128xf32>
    %28 = math.exp %27 : vector<2x128xf32>
    %29 = arith.addf %21, %28 : vector<2x128xf32>
    %c2_i32 = arith.constant 2 : i32
    %30 = vector.broadcast %c2_i32 : i32 to vector<2x128xi32>
    %31 = arith.cmpi eq, %4, %30 : vector<2x128xi32>
    %cst_16 = arith.constant 0.000000e+00 : f32
    %32 = vector.broadcast %cst_16 : f32 to vector<2x128xf32>
    %33 = arith.select %31, %27, %32 : vector<2x128xi1>, vector<2x128xf32>
    %34 = arith.addf %26, %33 : vector<2x128xf32>
    %35 = math.log %29 : vector<2x128xf32>
    %36 = arith.subf %34, %35 : vector<2x128xf32>
    %37 = math.exp %36 : vector<2x128xf32>
    %cst_17 = arith.constant 0.000000e+00 : f32
    %38 = vector.broadcast %cst_17 : f32 to vector<2x128xf32>
    %39 = arith.subf %38, %36 : vector<2x128xf32>
    %cst_18 = arith.constant 1.000000e+00 : f32
    %40 = vector.broadcast %cst_18 : f32 to vector<2x128xf32>
    %41 = arith.subf %40, %37 : vector<2x128xf32>
    %cst_19 = arith.constant 0.000000e+00 : f32
    %42 = vector.broadcast %cst_19 : f32 to vector<2x128xf32>
    %43 = arith.maximumf %41, %42 : vector<2x128xf32>
    %44 = arith.mulf %43, %43 : vector<2x128xf32>
    %45 = arith.mulf %44, %39 : vector<2x128xf32>
    %c0_20 = arith.constant 0 : index
    %c0_21 = arith.constant 0 : index
    %46 = vector.load %arg8[%c0_20, %c0_21] : memref<2x128xf32, #tpu.memory_space<vmem>>, vector<2x128xf32>
    %47 = arith.addf %46, %39 : vector<2x128xf32>
    %c0_22 = arith.constant 0 : index
    %c0_23 = arith.constant 0 : index
    %48 = vector.load %arg8[%c0_22, %c0_23] : memref<2x128xf32, #tpu.memory_space<vmem>>, vector<2x128xf32>
    tpu.vector_store %arg8[%c0_22, %c0_23], %47 {strides = array<i32>} : memref<2x128xf32, #tpu.memory_space<vmem>>, vector<2x128xf32>,
    %c0_24 = arith.constant 0 : index
    %c0_25 = arith.constant 0 : index
    %49 = vector.load %arg9[%c0_24, %c0_25] : memref<2x128xf32, #tpu.memory_space<vmem>>, vector<2x128xf32>
    %50 = arith.addf %49, %44 : vector<2x128xf32>
    %c0_26 = arith.constant 0 : index
    %c0_27 = arith.constant 0 : index
    %51 = vector.load %arg9[%c0_26, %c0_27] : memref<2x128xf32, #tpu.memory_space<vmem>>, vector<2x128xf32>
    tpu.vector_store %arg9[%c0_26, %c0_27], %50 {strides = array<i32>} : memref<2x128xf32, #tpu.memory_space<vmem>>, vector<2x128xf32>,
    %c0_28 = arith.constant 0 : index
    %c0_29 = arith.constant 0 : index
    %52 = vector.load %arg10[%c0_28, %c0_29] : memref<2x128xf32, #tpu.memory_space<vmem>>, vector<2x128xf32>
    %53 = arith.addf %52, %45 : vector<2x128xf32>
    %c0_30 = arith.constant 0 : index
    %c0_31 = arith.constant 0 : index
    %54 = vector.load %arg10[%c0_30, %c0_31] : memref<2x128xf32, #tpu.memory_space<vmem>>, vector<2x128xf32>
    tpu.vector_store %arg10[%c0_30, %c0_31], %53 {strides = array<i32>} : memref<2x128xf32, #tpu.memory_space<vmem>>, vector<2x128xf32>,
    %c0_i32_32 = arith.constant 0 : i32
    %55 = arith.cmpi eq, %arg2, %c0_i32_32 : i32
    %56 = arith.extui %55 : i1 to i32
    %c0_i32_33 = arith.constant 0 : i32
    %57 = arith.cmpi ne, %56, %c0_i32_33 : i32
    scf.if %57 {
      %c0_34 = arith.constant 0 : index
      %c0_35 = arith.constant 0 : index
      %58 = vector.load %arg8[%c0_34, %c0_35] : memref<2x128xf32, #tpu.memory_space<vmem>>, vector<2x128xf32>
      %59 = vector.shape_cast %58 : vector<2x128xf32> to vector<1x2x128xf32>
      %cst_36 = arith.constant dense<0.000000e+00> : vector<1xf32>
      %60 = vector.multi_reduction <add>, %59, %cst_36 [1, 2] : vector<1x2x128xf32> to vector<1xf32>
      %61 = vector.shape_cast %60 : vector<1xf32> to vector<1x1x1xf32>
      %62 = vector.extract %61[0, 0, 0] : f32 from vector<1x1x1xf32>
      %63 = vector.broadcast %62 : f32 to vector<1x1xf32>
      %c0_37 = arith.constant 0 : index
      %c0_38 = arith.constant 0 : index
      %c0_39 = arith.constant 0 : index
      %c0_40 = arith.constant 0 : index
      %64 = vector.load %arg5[%c0_37, %c0_38, %c0_39, %c0_40] : memref<1x1x1x1xf32, #tpu.memory_space<vmem>>, vector<1x1x1x1xf32>
      %65 = vector.shape_cast %64 : vector<1x1x1x1xf32> to vector<1x1xf32>
      %66 = vector.shape_cast %63 : vector<1x1xf32> to vector<1x1x1x1xf32>
      tpu.vector_store %arg5[%c0_37, %c0_38, %c0_39, %c0_40], %66 {strides = array<i32>} : memref<1x1x1x1xf32, #tpu.memory_space<vmem>>, vector<1x1x1x1xf32>,
      %c0_41 = arith.constant 0 : index
      %c0_42 = arith.constant 0 : index
      %67 = vector.load %arg9[%c0_41, %c0_42] : memref<2x128xf32, #tpu.memory_space<vmem>>, vector<2x128xf32>
      %68 = vector.shape_cast %67 : vector<2x128xf32> to vector<1x2x128xf32>
      %cst_43 = arith.constant dense<0.000000e+00> : vector<1xf32>
      %69 = vector.multi_reduction <add>, %68, %cst_43 [1, 2] : vector<1x2x128xf32> to vector<1xf32>
      %70 = vector.shape_cast %69 : vector<1xf32> to vector<1x1x1xf32>
      %71 = vector.extract %70[0, 0, 0] : f32 from vector<1x1x1xf32>
      %72 = vector.broadcast %71 : f32 to vector<1x1xf32>
      %c0_44 = arith.constant 0 : index
      %c0_45 = arith.constant 0 : index
      %c0_46 = arith.constant 0 : index
      %c0_47 = arith.constant 0 : index
      %73 = vector.load %arg6[%c0_44, %c0_45, %c0_46, %c0_47] : memref<1x1x1x1xf32, #tpu.memory_space<vmem>>, vector<1x1x1x1xf32>
      %74 = vector.shape_cast %73 : vector<1x1x1x1xf32> to vector<1x1xf32>
      %75 = vector.shape_cast %72 : vector<1x1xf32> to vector<1x1x1x1xf32>
      tpu.vector_store %arg6[%c0_44, %c0_45, %c0_46, %c0_47], %75 {strides = array<i32>} : memref<1x1x1x1xf32, #tpu.memory_space<vmem>>, vector<1x1x1x1xf32>,
      %c0_48 = arith.constant 0 : index
      %c0_49 = arith.constant 0 : index
      %76 = vector.load %arg10[%c0_48, %c0_49] : memref<2x128xf32, #tpu.memory_space<vmem>>, vector<2x128xf32>
      %77 = vector.shape_cast %76 : vector<2x128xf32> to vector<1x2x128xf32>
      %cst_50 = arith.constant dense<0.000000e+00> : vector<1xf32>
      %78 = vector.multi_reduction <add>, %77, %cst_50 [1, 2] : vector<1x2x128xf32> to vector<1xf32>
      %79 = vector.shape_cast %78 : vector<1xf32> to vector<1x1x1xf32>
      %80 = vector.extract %79[0, 0, 0] : f32 from vector<1x1x1xf32>
      %81 = vector.broadcast %80 : f32 to vector<1x1xf32>
      %c0_51 = arith.constant 0 : index
      %c0_52 = arith.constant 0 : index
      %c0_53 = arith.constant 0 : index
      %c0_54 = arith.constant 0 : index
      %82 = vector.load %arg7[%c0_51, %c0_52, %c0_53, %c0_54] : memref<1x1x1x1xf32, #tpu.memory_space<vmem>>, vector<1x1x1x1xf32>
      %83 = vector.shape_cast %82 : vector<1x1x1x1xf32> to vector<1x1xf32>
      %84 = vector.shape_cast %81 : vector<1x1xf32> to vector<1x1x1x1xf32>
      tpu.vector_store %arg7[%c0_51, %c0_52, %c0_53, %c0_54], %84 {strides = array<i32>} : memref<1x1x1x1xf32, #tpu.memory_space<vmem>>, vector<1x1x1x1xf32>,
    } else {
    }
    return
  }
  func.func @transform_0(%arg0: i32, %arg1: i32, %arg2: i32) -> (i32, i32, i32, i32) {
    %c1_i32 = arith.constant 1 : i32
    %0 = arith.muli %arg1, %c1_i32 : i32
    %1 = arith.addi %0, %arg2 : i32
    %c0_i32 = arith.constant 0 : i32
    %c0_i32_0 = arith.constant 0 : i32
    %c0_i32_1 = arith.constant 0 : i32
    return %arg0, %c0_i32, %1, %c0_i32_0 : i32, i32, i32, i32
  }
  func.func @transform_1(%arg0: i32, %arg1: i32, %arg2: i32) -> (i32, i32, i32, i32) {
    %c1_i32 = arith.constant 1 : i32
    %0 = arith.muli %arg1, %c1_i32 : i32
    %1 = arith.addi %0, %arg2 : i32
    %c0_i32 = arith.constant 0 : i32
    %c0_i32_0 = arith.constant 0 : i32
    %c0_i32_1 = arith.constant 0 : i32
    return %arg0, %c0_i32, %1, %c0_i32_0 : i32, i32, i32, i32
  }
  func.func @transform_2(%arg0: i32, %arg1: i32, %arg2: i32) -> (i32, i32, i32, i32) {
    %c0_i32 = arith.constant 0 : i32
    %c0_i32_0 = arith.constant 0 : i32
    %c0_i32_1 = arith.constant 0 : i32
    return %arg0, %arg1, %c0_i32, %c0_i32_0 : i32, i32, i32, i32
  }
  func.func @transform_3(%arg0: i32, %arg1: i32, %arg2: i32) -> (i32, i32, i32, i32) {
    %c0_i32 = arith.constant 0 : i32
    %c0_i32_0 = arith.constant 0 : i32
    %c0_i32_1 = arith.constant 0 : i32
    return %arg0, %arg1, %c0_i32, %c0_i32_0 : i32, i32, i32, i32
  }
  func.func @transform_4(%arg0: i32, %arg1: i32, %arg2: i32) -> (i32, i32, i32, i32) {
    %c0_i32 = arith.constant 0 : i32
    %c0_i32_0 = arith.constant 0 : i32
    %c0_i32_1 = arith.constant 0 : i32
    return %arg0, %arg1, %c0_i32, %c0_i32_0 : i32, i32, i32, i32
  }
}

</mosaic_0001>

<bundles_post_ra>
// kernel: tpu_custom_call.1
= control target key start
LH: loop header
LB: loop body
LE: loop exit
PB: predicated region body
PF: predicated region fallthrough
CT: control target
= control target key end

     0   :  { %10 = vsyncpa [#allocation6], 0  ;;  %s950_s0 = inlined_call_operand.hbm [shape: f32[2,3,2,128], index: 0, kind: input, shape index: {}]   ;;  %s951_s1 = inlined_call_operand.hbm [shape: s32[2,1,2,128], index: 1, kind: input, shape index: {}]   ;;  %s952_s2 = inlined_call_operand.vmem [shape: f32[2,1,1,1], index: 2, kind: output, shape index: {0}]   ;;  %s953_s3 = inlined_call_operand.vmem [shape: f32[2,1,1,1], index: 3, kind: output, shape index: {1}]   ;;  %s954_s4 = inlined_call_operand.vmem [shape: f32[2,1,1,1], index: 4, kind: output, shape index: {2}]  }
   0x1   :  { %12 = vsyncpa [#allocation6 + $0x1], 0 }
   0x2   :  { %13 = vsyncpa [#allocation8], 0 }
   0x3   :  { %15 = vsyncpa [#allocation8 + $0x1], 0  ;;  %s843_s15 = smov 0   ;;  %s845_s16 = smov 0  }
   0x4   :  { %s847_s17 = smov 0   ;;  %s849_s18 = smov 0  }
   0x5   :  { %s851_s19 = smov 0   ;;  %s853_s20 = smov 0  }
   0x6 LB: > { %s604_s21 = sadd.s32 4294967295, %s813_s20   ;;  %s40_s22 = sadd.s32 1, %s809_s19  ;;  %s813_s20 = sphi %s853_s20, %s21_s20   ;;  %s809_s19 = sphi %s851_s19, %s961_s19   ;;  %s805_s18 = sphi %s849_s18, %s960_s18   ;;  %s801_s17 = sphi %s847_s17, %s959_s17   ;;  %s797_s16 = sphi %s845_s16, %s958_s16   ;;  %s793_s15 = sphi %s843_s15, %s957_s15  }
   0x7   : > { %p42_p0 = scmp.ge.s32.totalorder %s40_s22, 2  ;;  %s51_s23 = sadd.s32 1, %s801_s17 }
   0x8   : > { %p58_p1 = scmp.ne.s32.totalorder %s801_s17, %s797_s16  ;;  %p59_p2 = scmp.eq.s32.totalorder %s813_s20, 0 }
   0x9   : > { %s963_s22 = smov (%p42_p0, %s40_s22), 0  ;;  %p64_p4 = scmp.ne.s32.totalorder %s797_s16, %s793_s15 }
   0xa   : > { %p60_p3 = por %p59_p2, %p58_p1  ;;  %s46_s24 = ssub.s32 %s809_s19, %s963_s22 }
   0xb   : > { %p65_p5 = scmp.eq.s32.totalorder %s604_s21, 0  ;;  %p49_p6 = scmp.eq.s32.totalorder %s46_s24, 0 }
   0xc   : > { %p637_p8 = scmp.lt.s32.totalorder %s813_s20, 2  ;;  %s202_s27 = sand.u32 1, %s801_s17  }
   0xd   : > { %p882_p7 = por %p65_p5, %p64_p4  ;;  %s618_s28 = smul.u32 6, %s809_s19 }
   0xe   : > { %s888_s26 = scalar_select %p49_p6, %s801_s17, %s51_s23  }
   0xf   : > { %s617_s29 = smul.u32 6, %s202_s27  ;;  %s213_s6 = scalar_lea.hbm %s950_s0, %s618_s28 }
  0x10   : > { %p895_p9 = pnand %p637_p8, %p60_p3  ;;  %s214_s8 = sshll.u32 %s213_s6, 4  ;;  %s215_s8 = int_to_ptr.hbm [resolvable:$true] %s214_s8 }
  0x11   : > { %s206_s9 = scalar_lea.vmem [#allocation5], %s617_s29  ;;  %s203_s11 = scalar_lea.sflag [#allocation6], %s202_s27 }
  0x12   : > { %s216_s10 = sshll.u32 %s206_s9, 4  ;;  %s815_s12 = smov 32   ;;  %s217_s10 = int_to_ptr.vmem [resolvable:$true] %s216_s10 }
  0x13   : > { %s816_s13 = smov 2   ;;  %p611_p10 = scmp.ge.s32.totalorder %s813_s20, 1 }
  0x14   : > { %633 = dma.hbm_to_vmem [thread:$0]  (!%p895_p9), %s215_s8, 96, %s217_s10, %s203_s11, %s815_s12, %s815_s12, %s816_s13  }
  0x15   : > { %p245_p11 = scmp.lt.s32.totalorder %s813_s20, 3  ;;  %s609_s14 = sshll.u32 %s202_s27, 1 }
  0x16   : > { %s610_s15 = sshll.u32 %s809_s19, 1  ;;  %s230_s21 = scalar_lea.vmem [#allocation7], %s609_s14 }
  0x17   : > { %p246_p12 = pnand %p611_p10, %p245_p11  ;;  %s240_s23 = sshll.u32 %s230_s21, 4  ;;  %s241_s23 = int_to_ptr.vmem [resolvable:$true] %s240_s23 }
  0x18   : > { %s236_s30 = scalar_lea.hbm %s951_s1, %s610_s15  ;;  %s227_s5 = scalar_lea.sflag [#allocation8], %s202_s27 }
  0x19   : > { %s238_s29 = sshll.u32 %s236_s30, 4  ;;  %249 = sbr.rel (%p246_p12) target bundleno = 275 (0x113), region = 28  ;;  %s239_s29 = int_to_ptr.hbm [resolvable:$true] %s238_s29 }
  0x1a   : > { %636 = dma.hbm_to_vmem [thread:$0]  (!%p895_p9), %s239_s29, 32, %s241_s23, %s227_s5  }
  0x1b   : > { %s251_s6 = sand.u32 (!%p246_p12), 1, %s797_s16  }
  0x1c   : > { %s619_s8 = smul.u32 (!%p246_p12), 6, %s251_s6  ;;  %s252_s9 = scalar_lea.sflag (!%p246_p12), [#allocation6], %s251_s6 }
  0x1e   : > { %s255_s10 = scalar_lea.vmem [#allocation5], %s619_s8 }
  0x1f   : > { %784 = dma.done.wait (%p882_p7), %s252_s9, 96  }
  0x20   : > { %786 = vsyncadd (%p882_p7), %s252_s9, 4294967200  ;;  %s612_s11 = sshll.u32 %s251_s6, 1  ;;  %s262_s12 = scalar_lea.sflag [#allocation8], %s251_s6 }
  0x21   : > { %s265_s13 = scalar_lea.vmem [#allocation7], %s612_s11 }
  0x22   : > { %788 = dma.done.wait (%p882_p7), %s262_s12, 32  }
  0x23   : > { %790 = vsyncadd (%p882_p7), %s262_s12, 4294967264  ;;  %v817_v0 = vmov 0.0   ;;  %v337_v1 = vld [vmem:[%s255_s10] sm:$0x3]  ;;  %v613_v2 = vld [vmem:[%s255_s10 + $0x2] sm:$0x3] }
  0x24   : > { %333 = vst [vmem:[#allocation2] sm:$0x3] %v817_v0  ;;  %v340_v3 = vmax.f32 %v337_v1, %v613_v2  ;;  %v614_v4 = vld [vmem:[%s255_s10 + $0x4] sm:$0x3]  ;;  %v336_v12 = vld [vmem:[%s265_s13] sm:$0x3] }
  0x25   : > { %334 = vst [vmem:[#allocation3] sm:$0x3] %v817_v0  ;;  %vm347_vm0 = vcmp.eq.s32.totalorder %v336_v12, 0  ;;  %vm353_vm1 = vcmp.eq.s32.totalorder %v336_v12, 1  ;;  %vm360_vm2 = vcmp.eq.s32.totalorder %v336_v12, 2  ;;  %vm386_vm3 = vcmask 1041408  }
  0x26   : > { %335 = vst [vmem:[#allocation4] sm:$0x3] %v817_v0  ;;  %v343_v5 = vmax.f32 %v340_v3, %v614_v4  ;;  %p311_p13 = scmp.lt.s32.totalorder %s805_s18, 1  ;;  %vm398_vm4 = vcmask 0  }
  0x28   : > { %v344_v6 = vsub.f32 %v337_v1, %v343_v5  ;;  %v349_v7 = vsub.f32 %v613_v2, %v343_v5  ;;  %v356_v8 = vsub.f32 %v614_v4, %v343_v5  ;;  %s965_s18 = smov (!%p311_p13, %s805_s18), 1 }
  0x29   : > { %s316_s7 = scalar_lea.vmem %s952_s2, %s965_s18  ;;  %s322_s23 = scalar_lea.vmem %s953_s3, %s965_s18 }
  0x2a   : > { %v345_v9 = vmul.f32 1.442695, %v344_v6  ;;  %v350_v10 = vmul.f32 1.442695, %v349_v7  ;;  %v357_v11 = vmul.f32 1.442695, %v356_v8  ;;  %s328_s29 = scalar_lea.vmem %s954_s4, %s965_s18 }
  0x2b   : > { %v348_v17 = vsel %vm347_vm0, %v344_v6, 0.0  ;;  %v354_v18 = vsel %vm353_vm1, %v349_v7, 0.0  ;;  %v361_v21 = vsel %vm360_vm2, %v356_v8, 0.0  ;;  %v373_v26 = vld [vmem:[#allocation2] sm:$0x3] }
  0x2c   : > { %689 = vpow2.f32 %v345_v9  ;;  %v355_v20 = vadd.f32 %v354_v18, %v348_v17  ;;  %v376_v35 = vld [vmem:[#allocation3] sm:$0x3] }
  0x2d   : > { %691 = vpow2.f32 %v350_v10  ;;  %v379_v37 = vld [vmem:[#allocation4] sm:$0x3] }
  0x2e   : > { %693 = vpow2.f32 %v357_v11  ;;  %v362_v22 = vadd.f32 %v361_v21, %v355_v20 }
  0x32   : > { %v690_v13 = vpop.eup %689 }
  0x33   : > { %v692_v14 = vpop.eup %691 }
  0x34   : > { %v694_v15 = vpop.eup %693  ;;  %v352_v16 = vadd.f32 %v692_v14, %v690_v13 }
  0x36   : > { %v359_v19 = vadd.f32 %v694_v15, %v352_v16 }
  0x38   : > { %695 = vlog2.f32 %v359_v19 }
  0x3e   : > { %v696_v23 = vpop.eup %695 }
  0x3f   : > { %v364_v24 = vmul.f32 0.6931472, %v696_v23 }
  0x41   : > { %v365_v25 = vsub.f32 %v362_v22, %v364_v24 }
  0x43   : > { %v368_v27 = vsub.f32 0.0, %v365_v25  ;;  %v366_v28 = vmul.f32 1.442695, %v365_v25 }
  0x45   : > { %v374_v29 = vadd.f32 %v373_v26, %v368_v27  ;;  %697 = vpow2.f32 %v366_v28 }
  0x47   : > { %375 = vst [vmem:[#allocation2] sm:$0x3] %v374_v29 }
  0x4b   : > { %v698_v30 = vpop.eup %697 }
  0x4c   : > { %v369_v31 = vsub.f32 1.0, %v698_v30 }
  0x4e   : > { %v385_v32 = vld [vmem:[#allocation2] sm:$0x3]  ;;  %v370_v33 = vmax.f32 %v369_v31, 0.0 }
  0x4f   : > { %v387_v34 = vsel %vm386_vm3, %v385_v32, 0.0 }
  0x50   : > { %388 = vadd.xlane.f32.xlu0 %v387_v34  ;;  %v371_v36 = vmul.f32 %v370_v33, %v370_v33 }
  0x52   : > { %v377_v38 = vadd.f32 %v376_v35, %v371_v36  ;;  %v372_v39 = vmul.f32 %v371_v36, %v368_v27 }
  0x54   : > { %378 = vst [vmem:[#allocation3] sm:$0x3] %v377_v38  ;;  %v380_v40 = vadd.f32 %v379_v37, %v372_v39 }
  0x56   : > { %381 = vst [vmem:[#allocation4] sm:$0x3] %v380_v40 }
  0x5b   : > { %v400_v41 = vld [vmem:[#allocation3] sm:$0x3] }
  0x5c   : > { %v401_v42 = vsel %vm386_vm3, %v400_v41, 0.0 }
  0x5d   : > { %402 = vadd.xlane.f32.xlu0 %v401_v42  ;;  %v413_v43 = vld [vmem:[#allocation4] sm:$0x3] }
  0x5e   : > { %v414_v44 = vsel %vm386_vm3, %v413_v43, 0.0 }
  0x5f   : > { %415 = vadd.xlane.f32.xlu1 %v414_v44 }
  0xc3   : > { %v389_v45 = vpop.xlane.xlu0 %388 }
  0xc4   : > { %v390_v46 = vrot.slane %v389_v45, 4 }
  0xc6   : > { %v391_v47 = vadd.f32 %v390_v46, %v389_v45 }
  0xc8   : > { %v392_v48 = vrot.slane %v391_v47, 2 }
  0xca   : > { %v393_v49 = vadd.f32 %v392_v48, %v391_v47 }
  0xcc   : > { %v394_v50 = vrot.slane %v393_v49, 1 }
  0xce   : > { %v395_v51 = vadd.f32 %v394_v50, %v393_v49 }
  0xd0   : > { %v403_v52 = vpop.xlane.xlu0 %402  ;;  %620 = vpush %v395_v51 }
  0xd1   : > { %v404_v53 = vrot.slane %v403_v52, 4 }
  0xd2   : > { %v416_v54 = vpop.xlane.xlu1 %415 }
  0xd3   : > { %v405_v55 = vadd.f32 %v404_v53, %v403_v52  ;;  %v417_v56 = vrot.slane %v416_v54, 4 }
  0xd5   : > { %v406_v57 = vrot.slane %v405_v55, 2  ;;  %v418_v58 = vadd.f32 %v417_v56, %v416_v54 }
  0xd7   : > { %v407_v59 = vadd.f32 %v406_v57, %v405_v55  ;;  %v419_v60 = vrot.slane %v418_v58, 2 }
  0xd9   : > { %v420_v61 = vadd.f32 %v419_v60, %v418_v58  ;;  %v408_v62 = vrot.slane %v407_v59, 1 }
  0xdb   : > { %v409_v63 = vadd.f32 %v408_v62, %v407_v59  ;;  %v421_v0 = vrot.slane %v420_v61, 1 }
  0xdd   : > { %622 = vpush %v409_v63  ;;  %v422_v1 = vadd.f32 %v421_v0, %v420_v61 }
  0xdf   : > { %624 = vpush %v422_v1 }
 0x101   : > { %s621_s14 = spop %620 }
 0x102   : > { %v397_v2 = vstv %s621_s14 }
 0x103   : > { %399 = vst.msk [vmem:[%s316_s7] sm:$0x1] %vm398_vm4, %v397_v2 }
 0x10e   : > { %s623_s24 = spop %622 }
 0x10f   : > { %v411_v3 = vstv %s623_s24 }
 0x110   : > { %412 = vst.msk [vmem:[%s322_s23] sm:$0x1] %vm398_vm4, %v411_v3  ;;  %s625_s5 = spop %624 }
 0x111   : > { %v424_v4 = vstv %s625_s5 }
 0x112   : > { %425 = vst.msk [vmem:[%s328_s29] sm:$0x1] %vm398_vm4, %v424_v4 }
 0x113 PF: > { %s21_s20 = sadd.s32 1, %s813_s20   ;;  %s957_s15 = smov %s797_s16 }
 0x114   : > { %p18_p0 = scmp.ge.s32.totalorder %s21_s20, 4   ;;  %s958_s16 = smov %s801_s17 }
 0x115   : > { %s959_s17 = smov %s888_s26  ;;  %s960_s18 = smov %s809_s19 }
 0x116   : > { %s961_s19 = smov %s963_s22  ;;  %20 = sbr.rel (!%p18_p0) target bundleno = 6 (0x6), region = 115 }
 0x11b   :  { %485 = vsyncpa [#allocation6], 1 }
 0x11c   :  { %487 = vsyncpa [#allocation6 + $0x1], 1 }
 0x11d   :  { %488 = vsyncpa [#allocation8], 1 }
 0x11e   :  { %490 = vsyncpa [#allocation8 + $0x1], 1 }

</bundles_post_ra>
